<compile_context>
chip_gen: v7x
topology: tpu7x:2x2x1
jax: 0.10.0
libtpu: 0.0.40
codegen_flags: <defaults>
</compile_context>

<pallas_src>
import functools

import jax
import jax.numpy as jnp
from jax import lax
from jax.experimental import pallas as pl
from jax.experimental.pallas import tpu as pltpu

_LN_EPS = 1e-5


def _encoder_kernel(obs_ref, w_ref, b_ref, g_ref, beta_ref, out_ref, *, inv_f):
    # Single fused MXU matmul: (TB, K) @ (K, F), f32 accumulation.
    h = lax.dot_general(
        obs_ref[...], w_ref[...],
        dimension_numbers=(((1,), (0,)), ((), ())),
        preferred_element_type=jnp.float32,
    )
    h = h + b_ref[...]                                   # (1, F) broadcasts over rows

    # LayerNorm over the feature axis (biased variance, as in nn.LayerNorm).
    inv_f = jnp.float32(inv_f)
    mean = jnp.sum(h, axis=-1, keepdims=True) * inv_f
    centered = h - mean
    var = jnp.sum(centered * centered, axis=-1, keepdims=True) * inv_f
    inv_std = lax.rsqrt(var + jnp.float32(_LN_EPS))       # EUP rsqrt

    h_norm = centered * inv_std * g_ref[...] + beta_ref[...]
    out_ref[...] = jnp.tanh(h_norm).astype(out_ref.dtype)  # EUP tanh epilogue


def prepare_encoder_params(w1, b1, w2, b2, gamma, beta, *, param_dtype=jnp.float32):
    """One-time parameter prep (hoist out of any jit/step loop).

    w1: (F, input_dim), w2: (F, F) in PyTorch nn.Linear (out, in) layout.
    Set param_dtype=jnp.bfloat16 when obs is bf16 so the MXU gets matched
    bf16 x bf16 operands (accumulation stays f32 inside the kernel).

    Returns:
      w_fused (input_dim, F) in param_dtype; b_fused, gamma, beta as (1, F) f32.

    NOTE: fusing the two bias-only linears (W2 @ W1, b1 @ W2^T + b2) is exact in
    math but changes rounding slightly vs two sequential matmuls (~1e-5 in f32).
    """
    w1 = jnp.asarray(w1, jnp.float32)
    b1 = jnp.asarray(b1, jnp.float32)
    w2 = jnp.asarray(w2, jnp.float32)
    b2 = jnp.asarray(b2, jnp.float32)
    gamma = jnp.asarray(gamma, jnp.float32)
    beta = jnp.asarray(beta, jnp.float32)

    # obs @ W1^T @ W2^T == obs @ (W2 @ W1)^T   (no nonlinearity between the linears)
    w_fused = jnp.dot(w2, w1).T.astype(param_dtype)       # (input_dim, F)
    b_fused = jnp.dot(b1, w2.T) + b2                      # (F,)
    return (w_fused,
            b_fused.reshape(1, -1),
            gamma.reshape(1, -1),
            beta.reshape(1, -1))


def _pick_block_b(batch, itemsize, target=2048):
    """Largest divisor of `batch` that is a multiple of the sublane tile and
    <= target, preferring >= 2 grid steps so v7x can shard the 'parallel' axis
    across both TensorCores.  Falls back to a single full-batch tile (block ==
    full array dims) for ragged small batches."""
    sub = 8 * max(1, 4 // max(1, itemsize))    # 8 rows f32, 16 bf16, 32 int8/fp8
    cap = min(target, batch)
    if batch >= 2 * sub:
        cap = min(cap, batch // 2)             # guarantee >= 2 grid steps when possible
    cand = cap - (cap % sub)
    while cand >= sub:
        if batch % cand == 0:
            return cand
        cand -= sub
    return batch


def action_or_reward_encoder_fwd(obs, w_fused, b_fused, gamma, beta, *,
                                 block_b=None, out_dtype=None, out_buffers=3):
    """obs: (B, input_dim) -> (B, feature_dim) = tanh(LayerNorm(fc(linear(obs))))."""
    B, K = obs.shape
    Kw, F = w_fused.shape
    assert K == Kw, "obs feature dim must match fused weight"
    out_dtype = obs.dtype if out_dtype is None else out_dtype

    if block_b is None:
        block_b = _pick_block_b(B, jnp.dtype(obs.dtype).itemsize)
    assert B % block_b == 0, "internal: block_b must divide B"
    assert block_b == B or block_b % 8 == 0, "batch tile must be a multiple of 8 sublanes"

    kernel = functools.partial(_encoder_kernel, inv_f=1.0 / float(F))

    def build(buffers):
        out_kwargs = {}
        if buffers > 2:
            out_kwargs = dict(pipeline_mode=pl.Buffered(buffers))
        try:
            out_spec = pl.BlockSpec((block_b, F), lambda i: (i, 0), **out_kwargs)
        except TypeError:
            out_spec = pl.BlockSpec((block_b, F), lambda i: (i, 0))
        return pl.pallas_call(
            kernel,
            out_shape=jax.ShapeDtypeStruct((B, F), out_dtype),
            grid=(B // block_b,),
            in_specs=[
                pl.BlockSpec((block_b, K), lambda i: (i, 0)),   # obs tile, streamed
                pl.BlockSpec((Kw, F), lambda i: (0, 0)),        # fused weight, resident
                pl.BlockSpec((1, F), lambda i: (0, 0)),         # fused bias, resident
                pl.BlockSpec((1, F), lambda i: (0, 0)),         # gamma, resident
                pl.BlockSpec((1, F), lambda i: (0, 0)),         # beta, resident
            ],
            out_specs=out_spec,
            compiler_params=pltpu.CompilerParams(dimension_semantics=("parallel",)),
        )

    if out_buffers > 2:
        try:
            return build(out_buffers)(obs, w_fused, b_fused, gamma, beta)
        except Exception:
            pass   # jax without multi-buffered output support: fall back to default depth
    return build(2)(obs, w_fused, b_fused, gamma, beta)


def _reference(obs, w1, b1, w2, b2, gamma, beta, eps=_LN_EPS):
    h = obs @ w1.T + b1
    h_fc = h @ w2.T + b2
    mean = h_fc.mean(-1, keepdims=True)
    var = ((h_fc - mean) ** 2).mean(-1, keepdims=True)
    h_norm = (h_fc - mean) / jnp.sqrt(var + eps) * gamma + beta
    return jnp.tanh(h_norm)


if __name__ == "__main__":
    batch = 64
    input_dim = 4
    feature_dim = 32

    key = jax.random.PRNGKey(0)
    k_obs, k_w1, k_b1, k_w2, k_b2 = jax.random.split(key, 5)

    obs = jax.random.normal(k_obs, (batch, input_dim), dtype=jnp.float32)

    # Deterministic synthetic parameters (PyTorch shapes: Linear weight is (out, in)).
    w1 = jax.random.normal(k_w1, (feature_dim, input_dim), jnp.float32) * 0.1
    b1 = jax.random.normal(k_b1, (feature_dim,), jnp.float32) * 0.1
    w2 = jax.random.normal(k_w2, (feature_dim, feature_dim), jnp.float32) * 0.1
    b2 = jax.random.normal(k_b2, (feature_dim,), jnp.float32) * 0.1
    gamma = jnp.ones((feature_dim,), jnp.float32)   # LayerNorm default init
    beta = jnp.zeros((feature_dim,), jnp.float32)

    # One-time parameter fusion (hoisted out of the training/step loop).
    w_fused, b_fused, g, bt = prepare_encoder_params(w1, b1, w2, b2, gamma, beta)

    # Auto block_b -> 32 rows here, grid=(2,) so both v7x TensorCores get work.
    out = action_or_reward_encoder_fwd(obs, w_fused, b_fused, g, bt)
    out = jax.block_until_ready(out)

    ref = _reference(obs, w1, b1, w2, b2, gamma, beta)
    assert out.shape == (batch, feature_dim)
    assert jnp.allclose(out, ref, atol=1e-4, rtol=1e-4), "mismatch vs reference"

    # TODO(synk): the PyTorch module's `self.outputs` bookkeeping and `detach` flag are
    # training-time side effects with no kernel equivalent; forward math is fully covered.
    print("KERNEL_OK")
</pallas_src>

<mosaic_0001>
module attributes {stable_mosaic.version = 11 : i64} {
  func.func @_encoder_kernel(%arg0: i32, %arg1: memref<32x4xf32, #tpu.memory_space<vmem>>, %arg2: memref<4x32xf32, #tpu.memory_space<vmem>>, %arg3: memref<1x32xf32, #tpu.memory_space<vmem>>, %arg4: memref<1x32xf32, #tpu.memory_space<vmem>>, %arg5: memref<1x32xf32, #tpu.memory_space<vmem>>, %arg6: memref<32x32xf32, #tpu.memory_space<vmem>>) attributes {dimension_semantics = [#tpu.dimension_semantics<parallel>], iteration_bounds = array<i64: 2>, scalar_prefetch = 0 : i64, scratch_operands = 0 : i64, tpu.core_type = #tpu.core_type<tc>, window_params = [{transform_indices = @transform_0, window_bounds = array<i64: 32, 4>}, {pipeline_mode = #tpu.pipeline_mode<synchronous>, transform_indices = @transform_1, window_bounds = array<i64: 4, 32>}, {pipeline_mode = #tpu.pipeline_mode<synchronous>, transform_indices = @transform_2, window_bounds = array<i64: 1, 32>}, {pipeline_mode = #tpu.pipeline_mode<synchronous>, transform_indices = @transform_3, window_bounds = array<i64: 1, 32>}, {pipeline_mode = #tpu.pipeline_mode<synchronous>, transform_indices = @transform_4, window_bounds = array<i64: 1, 32>}, {transform_indices = @transform_5, window_bounds = array<i64: 32, 32>}]} {
    %c0 = arith.constant 0 : index
    %c0_0 = arith.constant 0 : index
    %0 = vector.load %arg1[%c0, %c0_0] : memref<32x4xf32, #tpu.memory_space<vmem>>, vector<32x4xf32>
    %c0_1 = arith.constant 0 : index
    %c0_2 = arith.constant 0 : index
    %1 = vector.load %arg2[%c0_1, %c0_2] : memref<4x32xf32, #tpu.memory_space<vmem>>, vector<4x32xf32>
    %cst = arith.constant dense<0.000000e+00> : vector<32x32xf32>
    %2 = tpu.matmul %0, %1, %cst {dimension_numbers = #tpu.dot_dimension_numbers<[1], [0], [0], [1], [0, 0, 1, 1], [], []>} : vector<32x4xf32>, vector<4x32xf32>, vector<32x32xf32> -> vector<32x32xf32>
    %c0_3 = arith.constant 0 : index
    %c0_4 = arith.constant 0 : index
    %3 = vector.load %arg3[%c0_3, %c0_4] : memref<1x32xf32, #tpu.memory_space<vmem>>, vector<1x32xf32>
    %4 = vector.broadcast %3 : vector<1x32xf32> to vector<32x32xf32>
    %5 = arith.addf %2, %4 : vector<32x32xf32>
    %cst_5 = arith.constant dense<0.000000e+00> : vector<32xf32>
    %6 = vector.multi_reduction <add>, %5, %cst_5 [1] : vector<32x32xf32> to vector<32xf32>
    %7 = vector.shape_cast %6 : vector<32xf32> to vector<32x1xf32>
    %cst_6 = arith.constant 3.125000e-02 : f32
    %8 = vector.broadcast %cst_6 : f32 to vector<32x1xf32>
    %9 = arith.mulf %7, %8 : vector<32x1xf32>
    %10 = vector.broadcast %9 : vector<32x1xf32> to vector<32x32xf32>
    %11 = arith.subf %5, %10 : vector<32x32xf32>
    %12 = arith.mulf %11, %11 : vector<32x32xf32>
    %cst_7 = arith.constant dense<0.000000e+00> : vector<32xf32>
    %13 = vector.multi_reduction <add>, %12, %cst_7 [1] : vector<32x32xf32> to vector<32xf32>
    %14 = vector.shape_cast %13 : vector<32xf32> to vector<32x1xf32>
    %cst_8 = arith.constant 3.125000e-02 : f32
    %15 = vector.broadcast %cst_8 : f32 to vector<32x1xf32>
    %16 = arith.mulf %14, %15 : vector<32x1xf32>
    %cst_9 = arith.constant 9.99999974E-6 : f32
    %17 = vector.broadcast %cst_9 : f32 to vector<32x1xf32>
    %18 = arith.addf %16, %17 : vector<32x1xf32>
    %19 = math.rsqrt %18 : vector<32x1xf32>
    %20 = vector.broadcast %19 : vector<32x1xf32> to vector<32x32xf32>
    %21 = arith.mulf %11, %20 : vector<32x32xf32>
    %c0_10 = arith.constant 0 : index
    %c0_11 = arith.constant 0 : index
    %22 = vector.load %arg4[%c0_10, %c0_11] : memref<1x32xf32, #tpu.memory_space<vmem>>, vector<1x32xf32>
    %23 = vector.broadcast %22 : vector<1x32xf32> to vector<32x32xf32>
    %24 = arith.mulf %21, %23 : vector<32x32xf32>
    %c0_12 = arith.constant 0 : index
    %c0_13 = arith.constant 0 : index
    %25 = vector.load %arg5[%c0_12, %c0_13] : memref<1x32xf32, #tpu.memory_space<vmem>>, vector<1x32xf32>
    %26 = vector.broadcast %25 : vector<1x32xf32> to vector<32x32xf32>
    %27 = arith.addf %24, %26 : vector<32x32xf32>
    %28 = math.tanh %27 : vector<32x32xf32>
    %c0_14 = arith.constant 0 : index
    %c0_15 = arith.constant 0 : index
    %29 = vector.load %arg6[%c0_14, %c0_15] : memref<32x32xf32, #tpu.memory_space<vmem>>, vector<32x32xf32>
    tpu.vector_store %arg6[%c0_14, %c0_15], %28 {strides = array<i32>} : memref<32x32xf32, #tpu.memory_space<vmem>>, vector<32x32xf32>,
    return
  }
  func.func @transform_0(%arg0: i32) -> (i32, i32) {
    %c0_i32 = arith.constant 0 : i32
    %c0_i32_0 = arith.constant 0 : i32
    return %arg0, %c0_i32 : i32, i32
  }
  func.func @transform_1(%arg0: i32) -> (i32, i32) {
    %c0_i32 = arith.constant 0 : i32
    %c0_i32_0 = arith.constant 0 : i32
    %c0_i32_1 = arith.constant 0 : i32
    return %c0_i32, %c0_i32_0 : i32, i32
  }
  func.func @transform_2(%arg0: i32) -> (i32, i32) {
    %c0_i32 = arith.constant 0 : i32
    %c0_i32_0 = arith.constant 0 : i32
    %c0_i32_1 = arith.constant 0 : i32
    return %c0_i32, %c0_i32_0 : i32, i32
  }
  func.func @transform_3(%arg0: i32) -> (i32, i32) {
    %c0_i32 = arith.constant 0 : i32
    %c0_i32_0 = arith.constant 0 : i32
    %c0_i32_1 = arith.constant 0 : i32
    return %c0_i32, %c0_i32_0 : i32, i32
  }
  func.func @transform_4(%arg0: i32) -> (i32, i32) {
    %c0_i32 = arith.constant 0 : i32
    %c0_i32_0 = arith.constant 0 : i32
    %c0_i32_1 = arith.constant 0 : i32
    return %c0_i32, %c0_i32_0 : i32, i32
  }
  func.func @transform_5(%arg0: i32) -> (i32, i32) {
    %c0_i32 = arith.constant 0 : i32
    %c0_i32_0 = arith.constant 0 : i32
    return %arg0, %c0_i32 : i32, i32
  }
}

</mosaic_0001>

<bundles_post_ra>
// kernel: tpu_custom_call.1
= control target key start
LH: loop header
LB: loop body
LE: loop exit
PB: predicated region body
PF: predicated region fallthrough
CT: control target
= control target key end

     0   :  { %s577_s18 = smov 0   ;;  %s625_s0 = inlined_call_operand.vmem [shape: f32[64,4], index: 0, kind: input, shape index: {}]   ;;  %s626_s1 = inlined_call_operand.vmem [shape: f32[4,32], index: 1, kind: input, shape index: {}]   ;;  %s627_s2 = inlined_call_operand.vmem [shape: f32[1,32], index: 2, kind: input, shape index: {}]   ;;  %s628_s3 = inlined_call_operand.vmem [shape: f32[1,32], index: 3, kind: input, shape index: {}]   ;;  %s629_s4 = inlined_call_operand.vmem [shape: f32[1,32], index: 4, kind: input, shape index: {}]   ;;  %s630_s5 = inlined_call_operand.vmem [shape: f32[64,32], index: 5, kind: output, shape index: {}]  }
   0x1 LB: > { %s481_s19 = sadd.s32 4294967295, %s545_s18   ;;  %p485_p0 = scmp.ge.s32.totalorder %s545_s18, 1  ;;  %s545_s18 = sphi %s577_s18, %s15_s18  }
   0x2   : > { %p188_p1 = scmp.lt.s32.totalorder %s545_s18, 3 }
   0x4   : > { %p189_p2 = pnand %p485_p0, %p188_p1 }
   0x5   : > { %v232_v0 = vld [vmem:[%s626_s1] sm:$0xf] (!%p189_p2)  ;;  %vm253_vm0 = vcmask (!%p189_p2), 1043456   ;;  %s486_s22 = sshll.u32 (!%p189_p2), %s481_s19, 2  ;;  %vm240_vm1 = vcmask (!%p189_p2), 31744   ;;  %vm342_vm2 = vcmask (!%p189_p2), 261120  }
   0x6   : > { %192 = sbr.rel (%p189_p2) target bundleno = 566 (0x236), region = 40  ;;  %505 = vmatprep.subr.msk.mxu0 (!%p189_p2), %vm253_vm0, %v232_v0  ;;  %513 = vmatprep.subr.msk.mxu1 (!%p189_p2), %vm253_vm0, %v232_v0  ;;  %p217_p3 = scmp.lt.s32.totalorder (!%p189_p2), %s486_s22, 7  ;;  %v490_v5 = vld [vmem:[%s627_s2] ss:$0 sm:$0xff] (!%p189_p2) }
   0x7   : > { %506 = vmatpush3.msk.msra.mxu0 (!%p189_p2), %vm253_vm0, %v232_v0  ;;  %514 = vmatpush3.msk.msra.mxu1 (!%p189_p2), %vm253_vm0, %v232_v0  ;;  %v496_v51 = vld [vmem:[%s628_s3] ss:$0 sm:$0xff] (!%p189_p2) }
   0x8   : > { %v497_v53 = vld [vmem:[%s629_s4] ss:$0 sm:$0xff] (!%p189_p2) }
   0xd   : > { %s632_s22 = smov (!%p217_p3, %s486_s22), 7 }
   0xe   : > { %s487_s23 = sshll.u32 %s632_s22, 3 }
   0xf   : > { %s220_s26 = scalar_lea.vmem %s625_s0, %s487_s23  ;;  %s226_s10 = scalar_lea.vmem %s630_s5, %s487_s23 }
  0x10   : > { %v228_v1 = vld [vmem:[%s220_s26] sm:$0xff]  ;;  %v230_v2 = vld [vmem:[%s220_s26 + $0x10] sm:$0xff]  ;;  %v229_v3 = vld [vmem:[%s220_s26 + $0x8] sm:$0xff] }
  0x11   : > { %507 = vmatprep.mubr.msk.f32.mxu0 %vm240_vm1, %v228_v1  ;;  %510 = vmatprep.mubr.msk.f32.mxu1 %vm240_vm1, %v230_v2  ;;  %v231_v4 = vld [vmem:[%s220_s26 + $0x18] sm:$0xff] }
  0x12   : > { %508 = vmatmul.mubr.msk.f32.vlgmr.msra.gmra.mrb[0].mxu0 %vm240_vm1, %v229_v3  ;;  %511 = vmatmul.mubr.msk.f32.vlgmr.msra.gmra.mrb[0].mxu1 %vm240_vm1, %v231_v4 }
  0xe5   : > { %v509_v6 = vpop.f32.mrb[0].mxu0  ;;  %v512_v7 = vpop.f32.mrb[0].mxu1 }
  0xe6   : > { %v323_v8 = vpop.f32.mrb[1].mxu0  ;;  %v333_v9 = vpop.f32.mrb[1].mxu1  ;;  %v339_v10 = vadd.f32 %v512_v7, %v490_v5  ;;  %v329_v13 = vadd.f32 %v509_v6, %v490_v5 }
  0xe7   : > { %v324_v11 = vadd.f32 %v490_v5, %v323_v8  ;;  %v334_v12 = vadd.f32 %v490_v5, %v333_v9 }
  0xe8   : > { %v352_v16 = vsel %vm342_vm2, %v339_v10, 0.0  ;;  %v346_v17 = vsel %vm342_vm2, %v329_v13, 0.0 }
  0xe9   : > { %v349_v14 = vsel %vm342_vm2, %v334_v12, 0.0  ;;  %v343_v15 = vsel %vm342_vm2, %v324_v11, 0.0 }
  0xea   : > { %350 = vadd.xlane.f32.xlu1 %v349_v14  ;;  %344 = vadd.xlane.f32.xlu0 %v343_v15 }
  0xee   : > { %353 = vadd.xlane.f32.xlu1 %v352_v16  ;;  %347 = vadd.xlane.f32.xlu0 %v346_v17 }
 0x177   : > { %v351_v18 = vpop.xlane.xlu1 %350  ;;  %v345_v19 = vpop.xlane.xlu0 %344 }
 0x178   : > { %v357_v20 = vmul.f32 0.03125, %v351_v18  ;;  %v355_v21 = vmul.f32 0.03125, %v345_v19 }
 0x17a   : > { %v361_v22 = vsub.f32 %v334_v12, %v357_v20  ;;  %v359_v23 = vsub.f32 %v324_v11, %v355_v21 }
 0x17b   : > { %v354_v24 = vpop.xlane.xlu1 %353  ;;  %v348_v25 = vpop.xlane.xlu0 %347 }
 0x17c   : > { %v358_v26 = vmul.f32 0.03125, %v354_v24  ;;  %v356_v27 = vmul.f32 0.03125, %v348_v25  ;;  %v363_v28 = vmul.f32 %v359_v23, %v359_v23  ;;  %v365_v32 = vmul.f32 %v361_v22, %v361_v22 }
 0x17e   : > { %v362_v29 = vsub.f32 %v339_v10, %v358_v26  ;;  %v360_v30 = vsub.f32 %v329_v13, %v356_v27  ;;  %v367_v31 = vsel %vm342_vm2, %v363_v28, 0.0  ;;  %v373_v34 = vsel %vm342_vm2, %v365_v32, 0.0 }
 0x17f   : > { %368 = vadd.xlane.f32.xlu0 %v367_v31 }
 0x180   : > { %v364_v33 = vmul.f32 %v360_v30, %v360_v30  ;;  %v366_v36 = vmul.f32 %v362_v29, %v362_v29 }
 0x182   : > { %v370_v35 = vsel %vm342_vm2, %v364_v33, 0.0  ;;  %v376_v37 = vsel %vm342_vm2, %v366_v36, 0.0 }
 0x183   : > { %374 = vadd.xlane.f32.xlu0 %v373_v34  ;;  %371 = vadd.xlane.f32.xlu1 %v370_v35 }
 0x187   : > { %377 = vadd.xlane.f32.xlu1 %v376_v37 }
 0x20c   : > { %v369_v38 = vpop.xlane.xlu0 %368 }
 0x20d   : > { %v379_v39 = vmul.f32 0.03125, %v369_v38 }
 0x20f   : > { %v383_v40 = vadd.f32 1e-05, %v379_v39 }
 0x210   : > { %v372_v41 = vpop.xlane.xlu1 %371  ;;  %v375_v42 = vpop.xlane.xlu0 %374 }
 0x211   : > { %523 = vrsqrt.f32 %v383_v40  ;;  %v380_v43 = vmul.f32 0.03125, %v372_v41  ;;  %v381_v44 = vmul.f32 0.03125, %v375_v42 }
 0x213   : > { %v384_v45 = vadd.f32 1e-05, %v380_v43  ;;  %v385_v46 = vadd.f32 1e-05, %v381_v44 }
 0x214   : > { %v378_v47 = vpop.xlane.xlu1 %377 }
 0x215   : > { %525 = vrsqrt.f32 %v384_v45  ;;  %v382_v48 = vmul.f32 0.03125, %v378_v47 }
 0x216   : > { %527 = vrsqrt.f32 %v385_v46 }
 0x217   : > { %v386_v49 = vadd.f32 1e-05, %v382_v48 }
 0x219   : > { %529 = vrsqrt.f32 %v386_v49 }
 0x21b   : > { %v524_v50 = vpop.eup %523 }
 0x21c   : > { %v391_v52 = vmul.f32 %v524_v50, %v359_v23 }
 0x21e   : > { %v402_v54 = vmul.f32 %v496_v51, %v391_v52 }
 0x21f   : > { %v526_v55 = vpop.eup %525 }
 0x220   : > { %v528_v56 = vpop.eup %527  ;;  %v413_v57 = vadd.f32 %v497_v53, %v402_v54  ;;  %v392_v58 = vmul.f32 %v526_v55, %v360_v30 }
 0x221   : > { %v393_v59 = vmul.f32 %v528_v56, %v361_v22 }
 0x222   : > { %531 = vtanh.f32 %v413_v57  ;;  %v403_v60 = vmul.f32 %v496_v51, %v392_v58 }
 0x223   : > { %v530_v61 = vpop.eup %529  ;;  %v404_v62 = vmul.f32 %v496_v51, %v393_v59 }
 0x224   : > { %v414_v63 = vadd.f32 %v497_v53, %v403_v60  ;;  %v394_v0 = vmul.f32 %v530_v61, %v362_v29 }
 0x225   : > { %v415_v1 = vadd.f32 %v497_v53, %v404_v62 }
 0x226   : > { %533 = vtanh.f32 %v414_v63  ;;  %v405_v2 = vmul.f32 %v496_v51, %v394_v0 }
 0x227   : > { %535 = vtanh.f32 %v415_v1 }
 0x228   : > { %v416_v3 = vadd.f32 %v497_v53, %v405_v2 }
 0x22a   : > { %537 = vtanh.f32 %v416_v3 }
 0x22c   : > { %v532_v4 = vpop.eup %531 }
 0x22d   : > { %421 = vst.msk [vmem:[%s226_s10] sm:$0xff] %vm342_vm2, %v532_v4 }
 0x230   : > { %v534_v5 = vpop.eup %533 }
 0x231   : > { %v536_v6 = vpop.eup %535  ;;  %422 = vst.msk [vmem:[%s226_s10 + $0x8] sm:$0xff] %vm342_vm2, %v534_v5 }
 0x232   : > { %423 = vst.msk [vmem:[%s226_s10 + $0x10] sm:$0xff] %vm342_vm2, %v536_v6 }
 0x234   : > { %v538_v7 = vpop.eup %537 }
 0x235   : > { %424 = vst.msk [vmem:[%s226_s10 + $0x18] sm:$0xff] %vm342_vm2, %v538_v7 }
 0x236 PF: > { %s15_s18 = sadd.s32 1, %s545_s18  }
 0x237   : > { %p12_p4 = scmp.ge.s32.totalorder %s15_s18, 4  }
 0x239   :  { %14 = sbr.rel (!%p12_p4) target bundleno = 1 (0x1), region = 70 }

</bundles_post_ra>
